<compile_context>
chip_gen: v7x
topology: tpu7x:2x2x1
jax: 0.10.0
libtpu: 0.0.40
codegen_flags: <defaults>
</compile_context>

<pallas_src>
import jax
import jax.numpy as jnp
import numpy as np
from jax import lax
from jax.experimental import pallas as pl
from jax.experimental.pallas import tpu as pltpu


def _make_kernel(approx_recip: bool, share_score_matmul: bool):
    """Builds the fused bidirectional-attention kernel body (flags are trace-time static)."""

    def kernel(v1_ref, v2_ref, m1row_ref, m2row_ref, keep1_ref, keep2_ref,
               o1_ref, o2_ref):
        v1 = v1_ref[0]                 # (L1, D)  compute dtype (bf16 or f32)
        v2 = v2_ref[0]                 # (L2, D)
        m1_row = m1row_ref[0] > 0.5    # (1, L1) bool, True == masked
        m2_row = m2row_ref[0] > 0.5    # (1, L2) bool
        keep1 = keep1_ref[0]           # (L1, 1) f32: 0.0 where masked, else 1.0
        keep2 = keep2_ref[0]           # (L2, 1) f32

        fill = jnp.float32(-1e-07)     # NOTE: reproduces the module's literal -1e-07 fill.

        def softmax_lanes(scores):
            # Lane-axis softmax in f32.  Approx EUP reciprocal only on the fast path;
            # exact normalization on the f32 verification path (fixes the 3e-3 row errors).
            s = scores - jnp.max(scores, axis=-1, keepdims=True)
            e = jnp.exp(s)
            denom = jnp.sum(e, axis=-1, keepdims=True)
            if approx_recip:
                return e * pl.reciprocal(denom, approx=True)
            return e * (1.0 / denom)

        # ------------- Phase 1: dim=1 softmax (over L1) -> attended_v2 -------------
        # (L2, L1) layout: the reduction is lane-wise and the PV matmul needs no transpose.
        simT = lax.dot_general(v2, v1, (((1,), (1,)), ((), ())),
                               preferred_element_type=jnp.float32)        # (L2, L1)
        pT = softmax_lanes(jnp.where(m1_row, fill, simT))                 # v2_v1_attn^T
        att_v2 = jnp.dot(pT.astype(v1.dtype), v1,
                         preferred_element_type=jnp.float32)              # (L2, D)
        o2_ref[0] = (att_v2 * keep2).astype(o2_ref.dtype)

        # ------------- Phase 2: dim=2 softmax (over L2) -> attended_v1 -------------
        if share_score_matmul:
            # Compute-bound regime: reuse the scores via an XLU transpose instead of a
            # second MXU matmul (saves ~25% MXU cycles; costs one extra live score tile).
            sim = simT.T                                                  # (L1, L2)
        else:
            sim = lax.dot_general(v1, v2, (((1,), (1,)), ((), ())),
                                  preferred_element_type=jnp.float32)     # (L1, L2)
        p = softmax_lanes(jnp.where(m2_row, fill, sim))                   # v1_v2_attn
        att_v1 = jnp.dot(p.astype(v2.dtype), v2,
                         preferred_element_type=jnp.float32)              # (L1, D)
        o1_ref[0] = (att_v1 * keep1).astype(o1_ref.dtype)

    return kernel


def _vmem_limit_bytes(L1, L2, D, in_itemsize, out_itemsize, share_score_matmul):
    # Double-buffered I/O blocks + one phase's single-buffered f32 score live set + margin.
    per_copy = ((L1 + L2) * D * in_itemsize          # v1, v2 blocks
                + (L1 + L2) * D * out_itemsize       # o1, o2 blocks
                + 2 * (L1 + L2) * 4)                 # mask rows + keep columns (f32)
    live_score_tiles = 4 if share_score_matmul else 3
    scores = live_score_tiles * L1 * L2 * 4
    need = 2 * per_copy + scores
    need = need + need // 4 + (2 << 20)              # headroom for compiler scratch/sems
    cap = 48 * 1024 * 1024                           # safe on v7x (64 MiB/TC physical)
    try:
        cap = int(pltpu.get_tpu_info().vmem_capacity_bytes * 3 // 4)
    except Exception:
        pass
    return int(min(max(need, 32 * 1024 * 1024), cap))


def bidirectional_attention(v1, v1_mask, v2, v2_mask, *,
                            compute_dtype=jnp.bfloat16,
                            out_dtype=None,
                            approx_softmax_recip=None,
                            share_score_matmul=False):
    """Bidirectional soft attention (Pallas TPU).

    Args:
      v1: (B, L1, D) float32.   v1_mask: (B, L1) bool, True == masked position.
      v2: (B, L2, D) float32.   v2_mask: (B, L2) bool.
      compute_dtype: matmul operand dtype.  bf16 (default) is the production path
        (MXU-native, half the input DMA bytes).  float32 is a VERIFICATION-ONLY path:
        f32 MXU matmuls take multiple passes (~4-8x slower) and double HBM traffic.
      out_dtype: output dtype; defaults to compute_dtype (bf16 outputs ~33% less HBM
        writeback in the mem-bound regime).  Pass jnp.float32 for full-precision outputs.
      approx_softmax_recip: use the approximate EUP reciprocal for softmax normalization.
        Defaults to True only on the bf16 path; the f32 path uses an exact reciprocal.
      share_score_matmul: reuse phase-1 scores via an XLU transpose for phase 2
        (compute-bound shapes only; see header comment).

    Returns (attended_v1 (B, L1, D), attended_v2 (B, L2, D)) in out_dtype.
    """
    B, L1, D = v1.shape
    _, L2, _ = v2.shape

    compute_dtype = jnp.dtype(compute_dtype)
    out_dtype = compute_dtype if out_dtype is None else jnp.dtype(out_dtype)
    if approx_softmax_recip is None:
        approx_softmax_recip = compute_dtype != jnp.dtype(jnp.float32)

    # Lane-dense (1, L) rows for the in-softmax masking; tiny multiplicative (L, 1)
    # "keep" columns for the output masking (1.0 == keep, 0.0 == zero out).
    m1_row = v1_mask.astype(jnp.float32).reshape(B, 1, L1)
    m2_row = v2_mask.astype(jnp.float32).reshape(B, 1, L2)
    keep1 = jnp.where(v1_mask, 0.0, 1.0).astype(jnp.float32).reshape(B, L1, 1)
    keep2 = jnp.where(v2_mask, 0.0, 1.0).astype(jnp.float32).reshape(B, L2, 1)

    # Cast matmul operands in the wrapper so the HBM->VMEM DMAs are already narrow.
    v1_c = v1.astype(compute_dtype)
    v2_c = v2.astype(compute_dtype)

    vmem_limit = _vmem_limit_bytes(L1, L2, D,
                                   compute_dtype.itemsize, out_dtype.itemsize,
                                   share_score_matmul)

    grid_spec = pltpu.PrefetchScalarGridSpec(
        num_scalar_prefetch=0,
        grid=(B,),
        in_specs=[
            pl.BlockSpec((1, L1, D), lambda b: (b, 0, 0)),   # v1
            pl.BlockSpec((1, L2, D), lambda b: (b, 0, 0)),   # v2
            pl.BlockSpec((1, 1, L1), lambda b: (b, 0, 0)),   # v1 mask (row, lane-dense)
            pl.BlockSpec((1, 1, L2), lambda b: (b, 0, 0)),   # v2 mask (row, lane-dense)
            pl.BlockSpec((1, L1, 1), lambda b: (b, 0, 0)),   # keep column for att_v1 rows
            pl.BlockSpec((1, L2, 1), lambda b: (b, 0, 0)),   # keep column for att_v2 rows
        ],
        out_specs=[
            pl.BlockSpec((1, L1, D), lambda b: (b, 0, 0)),
            pl.BlockSpec((1, L2, D), lambda b: (b, 0, 0)),
        ],
    )

    kernel = _make_kernel(bool(approx_softmax_recip), bool(share_score_matmul))

    return pl.pallas_call(
        kernel,
        out_shape=(
            jax.ShapeDtypeStruct((B, L1, D), out_dtype),
            jax.ShapeDtypeStruct((B, L2, D), out_dtype),
        ),
        grid_spec=grid_spec,
        compiler_params=pltpu.CompilerParams(
            dimension_semantics=("parallel",),
            vmem_limit_bytes=vmem_limit),
    )(v1_c, v2_c, m1_row, m2_row, keep1, keep2)


def _reference(v1, v1_mask, v2, v2_mask):
    """Pure-JAX replica of the PyTorch forward, for verification."""
    sim = jnp.einsum("bld,bmd->blm", v1, v2)                       # (B, L1, L2)
    fill = jnp.float32(-1e-07)
    s1 = jnp.where(v1_mask[:, :, None], fill, sim)
    v2_v1_attn = jax.nn.softmax(s1, axis=1)
    s2 = jnp.where(v2_mask[:, None, :], fill, sim)
    v1_v2_attn = jax.nn.softmax(s2, axis=2)
    att_v1 = jnp.einsum("blm,bmd->bld", v1_v2_attn, v2)
    att_v2 = jnp.einsum("blm,bld->bmd", v2_v1_attn, v1)
    att_v1 = jnp.where(v1_mask[:, :, None], 0.0, att_v1)
    att_v2 = jnp.where(v2_mask[:, :, None], 0.0, att_v2)
    return att_v1, att_v2


if __name__ == "__main__":
    key = jax.random.PRNGKey(0)
    B, L1, L2, D = 2, 8, 16, 32
    k1, k2 = jax.random.split(key)
    v1 = jax.random.normal(k1, (B, L1, D), dtype=jnp.float32)
    v2 = jax.random.normal(k2, (B, L2, D), dtype=jnp.float32)

    # Deterministic padding masks: True == padded (masked) position.
    v1_lens = jnp.array([6, 8])
    v2_lens = jnp.array([16, 10])
    v1_mask = jnp.arange(L1)[None, :] >= v1_lens[:, None]   # (B, L1) bool
    v2_mask = jnp.arange(L2)[None, :] >= v2_lens[:, None]   # (B, L2) bool

    # ---- f32 verification path: exact softmax normalization -> tight structural check.
    ref_v1, ref_v2 = _reference(v1, v1_mask, v2, v2_mask)
    a1, a2 = jax.block_until_ready(
        bidirectional_attention(v1, v1_mask, v2, v2_mask, compute_dtype=jnp.float32))
    np.testing.assert_allclose(np.asarray(a1), np.asarray(ref_v1), rtol=3e-3, atol=3e-3)
    np.testing.assert_allclose(np.asarray(a2), np.asarray(ref_v2), rtol=3e-3, atol=3e-3)

    # ---- Default production path: bf16 matmuls + bf16 outputs + approx reciprocal.
    # Compare against the reference evaluated on bf16-rounded inputs so the check isolates
    # kernel error rather than input quantization.
    v1_b = v1.astype(jnp.bfloat16).astype(jnp.float32)
    v2_b = v2.astype(jnp.bfloat16).astype(jnp.float32)
    refb_v1, refb_v2 = _reference(v1_b, v1_mask, v2_b, v2_mask)
    b1, b2 = jax.block_until_ready(
        bidirectional_attention(v1, v1_mask, v2, v2_mask))
    assert b1.dtype == jnp.bfloat16 and b2.dtype == jnp.bfloat16
    np.testing.assert_allclose(np.asarray(b1.astype(jnp.float32)), np.asarray(refb_v1),
                               rtol=5e-2, atol=5e-2)
    np.testing.assert_allclose(np.asarray(b2.astype(jnp.float32)), np.asarray(refb_v2),
                               rtol=5e-2, atol=5e-2)

    print("KERNEL_OK")
</pallas_src>

<mosaic_0001>
module attributes {stable_mosaic.version = 11 : i64} {
  func.func @kernel(%arg0: i32, %arg1: memref<1x8x32xf32, #tpu.memory_space<vmem>>, %arg2: memref<1x16x32xf32, #tpu.memory_space<vmem>>, %arg3: memref<1x1x8xf32, #tpu.memory_space<vmem>>, %arg4: memref<1x1x16xf32, #tpu.memory_space<vmem>>, %arg5: memref<1x8x1xf32, #tpu.memory_space<vmem>>, %arg6: memref<1x16x1xf32, #tpu.memory_space<vmem>>, %arg7: memref<1x8x32xf32, #tpu.memory_space<vmem>>, %arg8: memref<1x16x32xf32, #tpu.memory_space<vmem>>) attributes {dimension_semantics = [#tpu.dimension_semantics<parallel>], iteration_bounds = array<i64: 2>, scalar_prefetch = 0 : i64, scratch_operands = 0 : i64, tpu.core_type = #tpu.core_type<tc>, window_params = [{transform_indices = @transform_0, window_bounds = array<i64: 1, 8, 32>}, {transform_indices = @transform_1, window_bounds = array<i64: 1, 16, 32>}, {transform_indices = @transform_2, window_bounds = array<i64: 1, 1, 8>}, {transform_indices = @transform_3, window_bounds = array<i64: 1, 1, 16>}, {transform_indices = @transform_4, window_bounds = array<i64: 1, 8, 1>}, {transform_indices = @transform_5, window_bounds = array<i64: 1, 16, 1>}, {transform_indices = @transform_6, window_bounds = array<i64: 1, 8, 32>}, {transform_indices = @transform_7, window_bounds = array<i64: 1, 16, 32>}]} {
    %c0 = arith.constant 0 : index
    %c0_0 = arith.constant 0 : index
    %c0_1 = arith.constant 0 : index
    %0 = vector.load %arg1[%c0, %c0_0, %c0_1] : memref<1x8x32xf32, #tpu.memory_space<vmem>>, vector<1x8x32xf32>
    %1 = vector.shape_cast %0 : vector<1x8x32xf32> to vector<8x32xf32>
    %c0_2 = arith.constant 0 : index
    %c0_3 = arith.constant 0 : index
    %c0_4 = arith.constant 0 : index
    %2 = vector.load %arg2[%c0_2, %c0_3, %c0_4] : memref<1x16x32xf32, #tpu.memory_space<vmem>>, vector<1x16x32xf32>
    %3 = vector.shape_cast %2 : vector<1x16x32xf32> to vector<16x32xf32>
    %c0_5 = arith.constant 0 : index
    %c0_6 = arith.constant 0 : index
    %c0_7 = arith.constant 0 : index
    %4 = vector.load %arg3[%c0_5, %c0_6, %c0_7] : memref<1x1x8xf32, #tpu.memory_space<vmem>>, vector<1x1x8xf32>
    %5 = vector.shape_cast %4 : vector<1x1x8xf32> to vector<1x8xf32>
    %cst = arith.constant 5.000000e-01 : f32
    %6 = vector.broadcast %cst : f32 to vector<1x8xf32>
    %7 = arith.cmpf ogt, %5, %6 : vector<1x8xf32>
    %c0_8 = arith.constant 0 : index
    %c0_9 = arith.constant 0 : index
    %c0_10 = arith.constant 0 : index
    %8 = vector.load %arg4[%c0_8, %c0_9, %c0_10] : memref<1x1x16xf32, #tpu.memory_space<vmem>>, vector<1x1x16xf32>
    %9 = vector.shape_cast %8 : vector<1x1x16xf32> to vector<1x16xf32>
    %cst_11 = arith.constant 5.000000e-01 : f32
    %10 = vector.broadcast %cst_11 : f32 to vector<1x16xf32>
    %11 = arith.cmpf ogt, %9, %10 : vector<1x16xf32>
    %c0_12 = arith.constant 0 : index
    %c0_13 = arith.constant 0 : index
    %c0_14 = arith.constant 0 : index
    %12 = vector.load %arg5[%c0_12, %c0_13, %c0_14] : memref<1x8x1xf32, #tpu.memory_space<vmem>>, vector<1x8x1xf32>
    %13 = vector.shape_cast %12 : vector<1x8x1xf32> to vector<8x1xf32>
    %c0_15 = arith.constant 0 : index
    %c0_16 = arith.constant 0 : index
    %c0_17 = arith.constant 0 : index
    %14 = vector.load %arg6[%c0_15, %c0_16, %c0_17] : memref<1x16x1xf32, #tpu.memory_space<vmem>>, vector<1x16x1xf32>
    %15 = vector.shape_cast %14 : vector<1x16x1xf32> to vector<16x1xf32>
    %cst_18 = arith.constant dense<0.000000e+00> : vector<16x8xf32>
    %16 = tpu.matmul %3, %1, %cst_18 {dimension_numbers = #tpu.dot_dimension_numbers<[1], [1], [0], [0], [0, 0, 1, 0], [], []>} : vector<16x32xf32>, vector<8x32xf32>, vector<16x8xf32> -> vector<16x8xf32>
    %cst_19 = arith.constant -1.000000e-07 : f32
    %17 = vector.shape_cast %7 : vector<1x8xi1> to vector<1x8xi1>
    %18 = vector.broadcast %17 : vector<1x8xi1> to vector<16x8xi1>
    %19 = vector.broadcast %cst_19 : f32 to vector<16x8xf32>
    %20 = arith.select %18, %19, %16 : vector<16x8xi1>, vector<16x8xf32>
    %cst_20 = arith.constant dense<0xFF800000> : vector<16xf32>
    %21 = vector.multi_reduction <maximumf>, %20, %cst_20 [1] : vector<16x8xf32> to vector<16xf32>
    %22 = vector.shape_cast %21 : vector<16xf32> to vector<16x1xf32>
    %23 = vector.broadcast %22 : vector<16x1xf32> to vector<16x8xf32>
    %24 = arith.subf %20, %23 : vector<16x8xf32>
    %25 = math.exp %24 : vector<16x8xf32>
    %cst_21 = arith.constant dense<0.000000e+00> : vector<16xf32>
    %26 = vector.multi_reduction <add>, %25, %cst_21 [1] : vector<16x8xf32> to vector<16xf32>
    %27 = vector.shape_cast %26 : vector<16xf32> to vector<16x1xf32>
    %cst_22 = arith.constant 1.000000e+00 : f32
    %28 = vector.broadcast %cst_22 : f32 to vector<16x1xf32>
    %29 = arith.divf %28, %27 : vector<16x1xf32>
    %30 = vector.broadcast %29 : vector<16x1xf32> to vector<16x8xf32>
    %31 = arith.mulf %25, %30 : vector<16x8xf32>
    %cst_23 = arith.constant dense<0.000000e+00> : vector<16x32xf32>
    %32 = tpu.matmul %31, %1, %cst_23 {dimension_numbers = #tpu.dot_dimension_numbers<[1], [0], [0], [1], [0, 0, 1, 1], [], []>} : vector<16x8xf32>, vector<8x32xf32>, vector<16x32xf32> -> vector<16x32xf32>
    %33 = vector.broadcast %15 : vector<16x1xf32> to vector<16x32xf32>
    %34 = arith.mulf %32, %33 : vector<16x32xf32>
    %c0_24 = arith.constant 0 : index
    %c0_25 = arith.constant 0 : index
    %c0_26 = arith.constant 0 : index
    %35 = vector.load %arg8[%c0_24, %c0_25, %c0_26] : memref<1x16x32xf32, #tpu.memory_space<vmem>>, vector<1x16x32xf32>
    %36 = vector.shape_cast %35 : vector<1x16x32xf32> to vector<16x32xf32>
    %37 = vector.shape_cast %34 : vector<16x32xf32> to vector<1x16x32xf32>
    tpu.vector_store %arg8[%c0_24, %c0_25, %c0_26], %37 {strides = array<i32>} : memref<1x16x32xf32, #tpu.memory_space<vmem>>, vector<1x16x32xf32>,
    %cst_27 = arith.constant dense<0.000000e+00> : vector<8x16xf32>
    %38 = tpu.matmul %1, %3, %cst_27 {dimension_numbers = #tpu.dot_dimension_numbers<[1], [1], [0], [0], [0, 0, 1, 0], [], []>} : vector<8x32xf32>, vector<16x32xf32>, vector<8x16xf32> -> vector<8x16xf32>
    %cst_28 = arith.constant -1.000000e-07 : f32
    %39 = vector.shape_cast %11 : vector<1x16xi1> to vector<1x16xi1>
    %40 = vector.broadcast %39 : vector<1x16xi1> to vector<8x16xi1>
    %41 = vector.broadcast %cst_28 : f32 to vector<8x16xf32>
    %42 = arith.select %40, %41, %38 : vector<8x16xi1>, vector<8x16xf32>
    %cst_29 = arith.constant dense<0xFF800000> : vector<8xf32>
    %43 = vector.multi_reduction <maximumf>, %42, %cst_29 [1] : vector<8x16xf32> to vector<8xf32>
    %44 = vector.shape_cast %43 : vector<8xf32> to vector<8x1xf32>
    %45 = vector.broadcast %44 : vector<8x1xf32> to vector<8x16xf32>
    %46 = arith.subf %42, %45 : vector<8x16xf32>
    %47 = math.exp %46 : vector<8x16xf32>
    %cst_30 = arith.constant dense<0.000000e+00> : vector<8xf32>
    %48 = vector.multi_reduction <add>, %47, %cst_30 [1] : vector<8x16xf32> to vector<8xf32>
    %49 = vector.shape_cast %48 : vector<8xf32> to vector<8x1xf32>
    %cst_31 = arith.constant 1.000000e+00 : f32
    %50 = vector.broadcast %cst_31 : f32 to vector<8x1xf32>
    %51 = arith.divf %50, %49 : vector<8x1xf32>
    %52 = vector.broadcast %51 : vector<8x1xf32> to vector<8x16xf32>
    %53 = arith.mulf %47, %52 : vector<8x16xf32>
    %cst_32 = arith.constant dense<0.000000e+00> : vector<8x32xf32>
    %54 = tpu.matmul %53, %3, %cst_32 {dimension_numbers = #tpu.dot_dimension_numbers<[1], [0], [0], [1], [0, 0, 1, 1], [], []>} : vector<8x16xf32>, vector<16x32xf32>, vector<8x32xf32> -> vector<8x32xf32>
    %55 = vector.broadcast %13 : vector<8x1xf32> to vector<8x32xf32>
    %56 = arith.mulf %54, %55 : vector<8x32xf32>
    %c0_33 = arith.constant 0 : index
    %c0_34 = arith.constant 0 : index
    %c0_35 = arith.constant 0 : index
    %57 = vector.load %arg7[%c0_33, %c0_34, %c0_35] : memref<1x8x32xf32, #tpu.memory_space<vmem>>, vector<1x8x32xf32>
    %58 = vector.shape_cast %57 : vector<1x8x32xf32> to vector<8x32xf32>
    %59 = vector.shape_cast %56 : vector<8x32xf32> to vector<1x8x32xf32>
    tpu.vector_store %arg7[%c0_33, %c0_34, %c0_35], %59 {strides = array<i32>} : memref<1x8x32xf32, #tpu.memory_space<vmem>>, vector<1x8x32xf32>,
    return
  }
  func.func @transform_0(%arg0: i32) -> (i32, i32, i32) {
    %c0_i32 = arith.constant 0 : i32
    %c0_i32_0 = arith.constant 0 : i32
    %c0_i32_1 = arith.constant 0 : i32
    return %arg0, %c0_i32, %c0_i32_0 : i32, i32, i32
  }
  func.func @transform_1(%arg0: i32) -> (i32, i32, i32) {
    %c0_i32 = arith.constant 0 : i32
    %c0_i32_0 = arith.constant 0 : i32
    %c0_i32_1 = arith.constant 0 : i32
    return %arg0, %c0_i32, %c0_i32_0 : i32, i32, i32
  }
  func.func @transform_2(%arg0: i32) -> (i32, i32, i32) {
    %c0_i32 = arith.constant 0 : i32
    %c0_i32_0 = arith.constant 0 : i32
    %c0_i32_1 = arith.constant 0 : i32
    return %arg0, %c0_i32, %c0_i32_0 : i32, i32, i32
  }
  func.func @transform_3(%arg0: i32) -> (i32, i32, i32) {
    %c0_i32 = arith.constant 0 : i32
    %c0_i32_0 = arith.constant 0 : i32
    %c0_i32_1 = arith.constant 0 : i32
    return %arg0, %c0_i32, %c0_i32_0 : i32, i32, i32
  }
  func.func @transform_4(%arg0: i32) -> (i32, i32, i32) {
    %c0_i32 = arith.constant 0 : i32
    %c0_i32_0 = arith.constant 0 : i32
    %c0_i32_1 = arith.constant 0 : i32
    return %arg0, %c0_i32, %c0_i32_0 : i32, i32, i32
  }
  func.func @transform_5(%arg0: i32) -> (i32, i32, i32) {
    %c0_i32 = arith.constant 0 : i32
    %c0_i32_0 = arith.constant 0 : i32
    %c0_i32_1 = arith.constant 0 : i32
    return %arg0, %c0_i32, %c0_i32_0 : i32, i32, i32
  }
  func.func @transform_6(%arg0: i32) -> (i32, i32, i32) {
    %c0_i32 = arith.constant 0 : i32
    %c0_i32_0 = arith.constant 0 : i32
    %c0_i32_1 = arith.constant 0 : i32
    return %arg0, %c0_i32, %c0_i32_0 : i32, i32, i32
  }
  func.func @transform_7(%arg0: i32) -> (i32, i32, i32) {
    %c0_i32 = arith.constant 0 : i32
    %c0_i32_0 = arith.constant 0 : i32
    %c0_i32_1 = arith.constant 0 : i32
    return %arg0, %c0_i32, %c0_i32_0 : i32, i32, i32
  }
}

</mosaic_0001>

<bundles_post_ra>
// kernel: tpu_custom_call.1
= control target key start
LH: loop header
LB: loop body
LE: loop exit
PB: predicated region body
PF: predicated region fallthrough
CT: control target
= control target key end

     0   :  { %13 = vsyncpa [#allocation3], 0  ;;  %s1417_s0 = inlined_call_operand.vmem [shape: f32[2,8,32], index: 0, kind: input, shape index: {}]   ;;  %s1418_s1 = inlined_call_operand.vmem [shape: f32[2,16,32], index: 1, kind: input, shape index: {}]   ;;  %s1419_s2 = inlined_call_operand.vmem [shape: f32[2,1,8], index: 2, kind: input, shape index: {}]   ;;  %s1420_s3 = inlined_call_operand.vmem [shape: f32[2,1,16], index: 3, kind: input, shape index: {}]   ;;  %s1421_s4 = inlined_call_operand.vmem [shape: f32[2,8,1], index: 4, kind: input, shape index: {}]   ;;  %s1422_s5 = inlined_call_operand.vmem [shape: f32[2,16,1], index: 5, kind: input, shape index: {}]   ;;  %s1423_s6 = inlined_call_operand.hbm [shape: f32[2,8,32], index: 6, kind: output, shape index: {0}]   ;;  %s1424_s7 = inlined_call_operand.hbm [shape: f32[2,16,32], index: 7, kind: output, shape index: {1}]  }
   0x1   :  { %15 = vsyncpa [#allocation3 + $0x1], 0 }
   0x2   :  { %16 = vsyncpa [#allocation5], 0 }
   0x3   :  { %18 = vsyncpa [#allocation5 + $0x1], 0  ;;  %s1225_s24 = smov 0   ;;  %s1227_s25 = smov 0  }
   0x4   :  { %s1229_s26 = smov 0   ;;  %s1231_s27 = smov 0  }
   0x5 LB: > { %s1246_s28 = sadd.s32 4294967295, %s1175_s27   ;;  %s943_s29 = sadd.s32 4294967294, %s1175_s27   ;;  %s1175_s27 = sphi %s1231_s27, %s1430_s27   ;;  %s1171_s26 = sphi %s1229_s26, %s1429_s26   ;;  %s1167_s25 = sphi %s1227_s25, %s1428_s25   ;;  %s1163_s24 = sphi %s1225_s24, %s1427_s24  }
   0x6   : > { %s1250_s30 = sadd.s32 1, %s1175_s27   ;;  %s187_s8 = sadd.s32 1, %s1171_s26 }
   0x7   : > { %s184_s9 = ssub.s32 %s1175_s27, %s1250_s30  ;;  %p197_p0 = scmp.ne.s32.totalorder %s1171_s26, %s1167_s25 }
   0x8   : > { %p185_p1 = scmp.eq.s32.totalorder %s184_s9, 0  ;;  %p198_p2 = scmp.eq.s32.totalorder %s1246_s28, 1 }
   0x9   : > { %p203_p3 = scmp.ne.s32.totalorder %s1167_s25, %s1163_s24  ;;  %p204_p4 = scmp.eq.s32.totalorder %s943_s29, 1 }
   0xa   : > { %s1261_s10 = scalar_select %p185_p1, %s1171_s26, %s187_s8  }
   0xb   : > { %p1263_p5 = por %p198_p2, %p197_p0  ;;  %p1267_p6 = por %p204_p4, %p203_p3 }
   0xc   : > { %p946_p7 = scmp.ge.s32.totalorder %s1175_s27, 1  ;;  %p290_p8 = scmp.lt.s32.totalorder %s1175_s27, 3 }
   0xe   : > { %p291_p9 = pnand %p946_p7, %p290_p8 }
   0xf   : > { %p346_p10 = scmp.lt.s32.totalorder (!%p291_p9), %s1246_s28, 1  ;;  %vm380_vm0 = vcmask (!%p291_p9), 261120   ;;  %v1177_v4 = vmov (!%p291_p9), 0   ;;  %v466_v5 = vlaneseq (!%p291_p9)  ;;  %vm473_vm3 = vcmask (!%p291_p9), 64512   ;;  %s1324_s20 = sand.u32 (!%p291_p9), 1, %s1167_s25  }
  0x10   : > { %294 = sbr.rel (%p291_p9) target bundleno = 1327 (0x52f), region = 44  ;;  %1067 = vset.pattern.permute.xlu0 (!%p291_p9), %v1177_v4  ;;  %1068 = vset.pattern.permute.xlu1 (!%p291_p9), %v1177_v4  ;;  %v1178_v27 = vmov (!%p291_p9), 0.0|0.0   ;;  %vm1179_vm4 = vmmov (!%p291_p9), 0   ;;  %v1180_v28 = vmov (!%p291_p9), 0.0   ;;  %vm1012_vm5 = vmpackc.low (!%p291_p9), %vm380_vm0, %vm380_vm0  ;;  %vm670_vm8 = vcmask (!%p291_p9), 130048   ;;  %s769_s17 = scalar_lea.sflag (!%p291_p9), [#allocation5], %s1324_s20 }
  0x11   : > { %v467_v7 = vshrl.u32 (!%p291_p9), %v466_v5, 7 }
  0x13   : > { %v468_v8 = vsub.s32 (!%p291_p9), 0, %v467_v7 }
  0x17   : > { %s1275_s13 = scalar_select %p346_p10, %s1246_s28, 1 }
  0x19   : > { %s949_s14 = sshll.u32 %s1275_s13, 3  ;;  %s971_s15 = sshll.u32 %s1275_s13, 4 }
  0x1a   : > { %s349_s18 = scalar_lea.vmem %s1417_s0, %s949_s14  ;;  %s354_s21 = scalar_lea.vmem %s1418_s1, %s971_s15 }
  0x1b   : > { %v1289_v0 = vld [vmem:[%s349_s18] sm:$0xff]  ;;  %v372_v2 = vld [vmem:[%s354_s21 + $0x8] sm:$0xff]  ;;  %s357_s29 = scalar_lea.vmem %s1419_s2, %s1275_s13  ;;  %s360_s16 = scalar_lea.vmem %s1420_s3, %s1275_s13 }
  0x1c   : > { %v371_v1 = vld [vmem:[%s354_s21] sm:$0xff]  ;;  %986 = vmatprep.subr.msk.mxu0 %vm380_vm0, %v1289_v0  ;;  %991 = vmatprep.subr.mxu1 %v1289_v0  ;;  %s369_s19 = scalar_lea.vmem %s1422_s5, %s971_s15  ;;  %s948_s21 = sshll.u32 %s1324_s20, 4 }
  0x1d   : > { %988 = vmatprep.mubr.msk.f32.mxu0 %vm380_vm0, %v371_v1  ;;  %v1011_v3 = vpack.c.bf16 %v372_v2, %v371_v1  ;;  %987 = vmatpush3.xpose.msk.msra.mxu0 %vm380_vm0, %v1289_v0  ;;  %v373_v6 = vld [vmem:[%s357_s29] sm:$0x1]  ;;  %s345_s22 = scalar_lea.vmem [#allocation4], %s948_s21  ;;  %v379_v52 = vld [vmem:[%s369_s19 + $0x8] sm:$0xff]  ;;  %s364_s29 = scalar_lea.vmem %s1421_s4, %s949_s14 }
  0x1e   : > { %992 = vmatpush3.msra.mxu1 %v1289_v0  ;;  %vm374_vm1 = vcmp.gt.f32.partialorder %v373_v6, 0.5  ;;  %1014 = vmatprep.subr.bf16.mxu0 %v1178_v27  ;;  %v375_v35 = vld [vmem:[%s360_s16] sm:$0x1]  ;;  %s795_s8 = sshll.u32 %s345_s22, 4  ;;  %s973_s13 = sshll.u32 %s1246_s28, 8  ;;  %s1336_s8 = int_to_ptr.vmem [resolvable:$true] %s795_s8 }
  0x1f   : > { %v465_v9 = vsel %vm374_vm1, 1, %v1177_v4  ;;  %1010 = vmatprep.subr.bf16.mxu1 %v1178_v27  ;;  %vm376_vm6 = vcmp.gt.f32.partialorder %v375_v35, 0.5  ;;  %v378_v44 = vld [vmem:[%s369_s19] sm:$0xff]  ;;  %s1342_s16 = scalar_lea.hbm %s1424_s7, %s973_s13  ;;  %s1081_s18 = scalar_lea.vmem %s1336_s8, 256 }
  0x20   : > { %989 = vmatmul.mubr.msk.f32.vlgmr.msra.gmra.mrb[0].mxu0 %vm380_vm0, %v372_v2  ;;  %v469_v10 = vrot.slane %v465_v9, %v468_v8  ;;  %v663_v36 = vsel %vm376_vm6, 1, %v1177_v4  ;;  %v377_v53 = vld [vmem:[%s364_s29] sm:$0xff]  ;;  %p1082_p11 = scmp.ne.s32.totalorder %s1336_s8, %s1081_s18  ;;  %s1181_s19 = smov [#allocation4]  }
  0x21   : > { %1016 = vmatpush3.bf16.msra.mxu0 %v1011_v3  ;;  %1007 = vmatprep.mubr.msk.f32.mxu0 %vm1179_vm4, %v1180_v28  ;;  %v667_v39 = vrot.slane %v663_v36, %v468_v8  ;;  %s1085_s21 = sshll.u32 %s1181_s19, 4  ;;  %s1086_s21 = int_to_ptr.vmem [resolvable:$false] %s1085_s21 }
  0x22   : > { %vm470_vm2 = vcmp.eq.s32.totalorder %v469_v10, 1  ;;  %p1083_p12 = pnand %p1082_p11, %p1263_p5  ;;  %p1088_p0 = scmp.lt.s32.totalorder %s1336_s8, %s1086_s21 }
  0x23   : > { %vm668_vm7 = vcmp.eq.s32.totalorder %v667_v39, 1 }
  0x24   : > { %p1084_p13 = pneg %p1083_p12 }
  0xf3   : > { %v990_v11 = vpop.f32.mrb[0].mxu0 }
  0xf4   : > { %v456_v12 = vpop.f32.mrb[1].mxu0  ;;  %v472_v15 = vsel %vm470_vm2, -1e-07, %v990_v11 }
  0xf5   : > { %v471_v13 = vsel %vm470_vm2, -1e-07, %v456_v12  ;;  %v477_v16 = vsel %vm473_vm3, %v472_v15, -inf }
  0xf6   : > { %v474_v14 = vsel %vm473_vm3, %v471_v13, -inf }
  0xf7   : > { %475 = vmax.xlane.f32.xlu0 %v474_v14 }
  0xfb   : > { %478 = vmax.xlane.f32.xlu0 %v477_v16 }
 0x184   : > { %v476_v17 = vpop.xlane.xlu0 %475 }
 0x185   : > { %v480_v18 = vsub.f32 %v471_v13, %v476_v17 }
 0x187   : > { %v482_v19 = vmul.f32 1.442695, %v480_v18 }
 0x188   : > { %v479_v20 = vpop.xlane.xlu0 %478 }
 0x189   : > { %1069 = vpow2.f32 %v482_v19  ;;  %v481_v21 = vsub.f32 %v472_v15, %v479_v20 }
 0x18b   : > { %v484_v22 = vmul.f32 1.442695, %v481_v21 }
 0x18d   : > { %1071 = vpow2.f32 %v484_v22 }
 0x193   : > { %v1070_v23 = vpop.eup %1069 }
 0x194   : > { %v486_v24 = vsel %vm473_vm3, %v1070_v23, 0.0 }
 0x195   : > { %487 = vadd.xlane.f32.xlu1 %v486_v24 }
 0x197   : > { %v1072_v25 = vpop.eup %1071 }
 0x198   : > { %v489_v26 = vsel %vm473_vm3, %v1072_v25, 0.0 }
 0x199   : > { %490 = vadd.xlane.f32.xlu1 %v489_v26 }
 0x222   : > { %v488_v29 = vpop.xlane.xlu1 %487 }
 0x223   : > { %1073 = vrcp.f32 %v488_v29 }
 0x226   : > { %v491_v30 = vpop.xlane.xlu1 %490 }
 0x227   : > { %1075 = vrcp.f32 %v491_v30 }
 0x22d   : > { %v1074_v31 = vpop.eup %1073 }
 0x22e   : > { %v496_v32 = vmul.f32 %v1074_v31, %v1070_v23 }
 0x230   : > { %993 = vmatprep.mubr.msk.f32.mxu1 %vm473_vm3, %v496_v32 }
 0x231   : > { %v1076_v33 = vpop.eup %1075 }
 0x232   : > { %v497_v34 = vmul.f32 %v1076_v33, %v1072_v25 }
 0x234   : > { %994 = vmatmul.mubr.msk.f32.vlgmr.msra.gmra.mrb[0].mxu1 %vm473_vm3, %v497_v34 }
 0x235   : > { %1013 = vmatpush3.bf16.xpose.msk.msra.mxu1 %vm1012_vm5, %v1011_v3  ;;  %1000 = vmatprep.mubr.msk.f32.mxu1 %vm1179_vm4, %v1180_v28 }
 0x23c   : > { %1001 = vmatmul.mubr.msk.f32.vlgmr.msra.gmra.mrb[2].mxu1 %vm380_vm0, %v1289_v0 }
 0x307   : > { %v995_v37 = vpop.f32.mrb[0].mxu1 }
 0x308   : > { %v570_v38 = vpop.f32.mrb[1].mxu1 }
 0x30f   : > { %v659_v40 = vpop.f32.mrb[2].mxu1 }
 0x310   : > { %v669_v41 = vsel %vm668_vm7, -1e-07, %v659_v40  ;;  %v1002_v42 = vpop.f32.mrb[3].mxu1 }
 0x311   : > { %v671_v43 = vsel %vm670_vm8, %v669_v41, -inf }
 0x312   : > { %672 = vmax.xlane.f32.xlu0 %v671_v43 }
 0x328   : > { %581 = vperm.xlu0 %1067, %v378_v44  }
 0x39f   : > { %v673_v45 = vpop.xlane.xlu0 %672 }
 0x3a0   : > { %v674_v46 = vsub.f32 %v669_v41, %v673_v45 }
 0x3a2   : > { %v675_v47 = vmul.f32 1.442695, %v674_v46 }
 0x3a4   : > { %1077 = vpow2.f32 %v675_v47 }
 0x3a7   : > { %v582_v48 = vpop.permute.xlu0 %581 }
 0x3a8   : > { %v589_v49 = vmul.f32 %v582_v48, %v570_v38 }
 0x3aa   : > { %591 = vst.msk [vmem:[%s345_s22] sm:$0xff] %vm380_vm0, %v589_v49 }
 0x3ae   : > { %v1078_v50 = vpop.eup %1077 }
 0x3af   : > { %v677_v51 = vsel %vm670_vm8, %v1078_v50, 0.0 }
 0x3b0   : > { %678 = vadd.xlane.f32.xlu1 %v677_v51 }
 0x3c1   : > { %586 = vperm.xlu1 %1068, %v379_v52  }
 0x3c5   : > { %758 = vperm.xlu1 %1068, %v377_v53  }
 0x43d   : > { %v679_v54 = vpop.xlane.xlu1 %678 }
 0x43e   : > { %1079 = vrcp.f32 %v679_v54 }
 0x441   : > { %v587_v55 = vpop.permute.xlu1 %586 }
 0x442   : > { %v590_v56 = vmul.f32 %v995_v37, %v587_v55 }
 0x444   : > { %592 = vst.msk [vmem:[%s345_s22 + $0x8] sm:$0xff] %vm380_vm0, %v590_v56  ;;  %s1087_s22 = scalar_lea.vmem %s1086_s21, 512 }
 0x445   : > { %p1089_p1 = scmp.lt.s32.totalorder %s1087_s22, %s1081_s18 }
 0x447   : > { %p1090_p2 = por %p1089_p1, %p1088_p0 }
 0x448   : > { %v1080_v57 = vpop.eup %1079 }
 0x449   : > { %v682_v58 = vmul.f32 %v1080_v57, %v1078_v50  ;;  %p1091_p3 = pnand %p1090_p2, %p1084_p13 }
 0x44b   : > { %1008 = vmatmul.mubr.msk.f32.vlgmr.msra.gmra.mrb[2].mxu0 %vm670_vm8, %v682_v58 }
 0x44c   : > { %1094 = shalt.err (!%p1091_p3)
}
 0x44d   : > { %s1095_s15 = scalar_lea.hbm %s1342_s16, 256  ;;  %s1099_s13 = scalar_lea.hbm %s1424_s7, 512 }
 0x44e   : > { %p1096_p4 = scmp.ne.s32.totalorder %s1342_s16, %s1095_s15  ;;  %p1100_p9 = scmp.lt.u32.totalorder %s1342_s16, %s1424_s7 }
 0x44f   : > { %p1101_p10 = scmp.lt.u32.totalorder %s1099_s13, %s1095_s15  ;;  %p1103_p12 = scmp.lt.u32.totalorder %s1095_s15, %s1342_s16 }
 0x450   : > { %p1097_p7 = pnand %p1096_p4, %p1263_p5 }
 0x451   : > { %p1102_p11 = por %p1101_p10, %p1100_p9 }
 0x452   : > { %p1098_p8 = pneg %p1097_p7 }
 0x453   : > { %p1104_p13 = por %p1103_p12, %p1102_p11 }
 0x455   : > { %p1105_p0 = pnand %p1104_p13, %p1098_p8 }
 0x457   : > { %1108 = shalt.err (!%p1105_p0)
}
 0x458   : > { %s1182_s18 = smov 128   ;;  %s1183_s19 = smov 8   ;;  %v759_v59 = vpop.permute.xlu1 %758 }
 0x459   : > { %1018 = dma.vmem_to_hbm [thread:$0]  (%p1263_p5), %s1336_s8, 256, %s1342_s16, %s769_s17, %s1182_s18, %s1182_s18, %s1183_s19  }
 0x45a   : > { %s947_s21 = sshll.u32 %s1324_s20, 3  ;;  %s966_s22 = sshll.u32 %s1246_s28, 7 }
 0x45b   : > { %s338_s23 = scalar_lea.vmem [#allocation2], %s947_s21  ;;  %s1373_s14 = scalar_lea.hbm %s1423_s6, %s966_s22 }
 0x45c   : > { %s782_s15 = sshll.u32 %s338_s23, 4  ;;  %s764_s8 = scalar_lea.sflag [#allocation3], %s1324_s20  ;;  %s1375_s15 = int_to_ptr.vmem [resolvable:$true] %s782_s15 }
 0x45d   : > { %s1109_s28 = scalar_lea.vmem %s1375_s15, 128  ;;  %s1184_s16 = smov [#allocation2]  }
 0x45e   : > { %p1110_p1 = scmp.ne.s32.totalorder %s1375_s15, %s1109_s28  ;;  %s1113_s17 = sshll.u32 %s1184_s16, 4  ;;  %s1114_s17 = int_to_ptr.vmem [resolvable:$false] %s1113_s17 }
 0x45f   : > { %s1115_s9 = scalar_lea.vmem %s1114_s17, 256  ;;  %p1116_p4 = scmp.lt.s32.totalorder %s1375_s15, %s1114_s17 }
 0x460   : > { %p1111_p2 = pnand %p1110_p1, %p1263_p5  ;;  %p1117_p7 = scmp.lt.s32.totalorder %s1115_s9, %s1109_s28 }
 0x462   : > { %p1112_p3 = pneg %p1111_p2  ;;  %p1118_p8 = por %p1117_p7, %p1116_p4 }
 0x464   : > { %p1119_p9 = pnand %p1118_p8, %p1112_p3 }
 0x51e   : > { %v752_v60 = vpop.f32.mrb[2].mxu0 }
 0x51f   : > { %v761_v61 = vmul.f32 %v759_v59, %v752_v60  ;;  %v1009_v62 = vpop.f32.mrb[3].mxu0 }
 0x521   : > { %762 = vst.msk [vmem:[%s338_s23] sm:$0xff] %vm380_vm0, %v761_v61 }
 0x522   : > { %1122 = shalt.err (!%p1119_p9)
}
 0x523   : > { %s1123_s20 = scalar_lea.hbm %s1373_s14, 128  ;;  %s1127_s21 = scalar_lea.hbm %s1423_s6, 256 }
 0x524   : > { %p1124_p10 = scmp.ne.s32.totalorder %s1373_s14, %s1123_s20  ;;  %p1128_p13 = scmp.lt.u32.totalorder %s1373_s14, %s1423_s6 }
 0x525   : > { %p1129_p0 = scmp.lt.u32.totalorder %s1127_s21, %s1123_s20  ;;  %p1131_p2 = scmp.lt.u32.totalorder %s1123_s20, %s1373_s14 }
 0x526   : > { %p1125_p11 = pnand %p1124_p10, %p1263_p5 }
 0x527   : > { %p1130_p1 = por %p1129_p0, %p1128_p13 }
 0x528   : > { %p1126_p12 = pneg %p1125_p11 }
 0x529   : > { %p1132_p3 = por %p1131_p2, %p1130_p1 }
 0x52b   : > { %p1133_p4 = pnand %p1132_p3, %p1126_p12 }
 0x52d   : > { %1136 = shalt.err (!%p1133_p4)
}
 0x52e   : > { %1017 = dma.vmem_to_hbm [thread:$0]  (%p1263_p5), %s1375_s15, 128, %s1373_s14, %s764_s8  }
 0x52f PF: > { %p1028_p7 = scmp.ge.s32.totalorder %s1175_s27, 2  ;;  %s810_s29 = sand.u32 1, %s1163_s24  }
 0x530   : > { %s811_s13 = scalar_lea.sflag [#allocation3], %s810_s29 }
 0x531   : > { %p1022_p8 = pnand %p1028_p7, %p1267_p6 }
 0x533   : > { %1154 = dma.done.wait (!%p1022_p8), %s811_s13, 128  }
 0x534   : > { %1156 = vsyncadd (!%p1022_p8), %s811_s13, 4294967168  ;;  %s820_s28 = scalar_lea.sflag [#allocation5], %s810_s29 }
 0x535   : > { %1158 = dma.done.wait (!%p1022_p8), %s820_s28, 256  }
 0x536   : > { %1160 = vsyncadd (!%p1022_p8), %s820_s28, 4294967040  ;;  %p21_p5 = scmp.ge.s32.totalorder %s1250_s30, 4   ;;  %s1427_s24 = smov %s1167_s25 }
 0x537   : > { %s1428_s25 = smov %s1171_s26  ;;  %s1429_s26 = smov %s1261_s10 }
 0x538   : > { %s1430_s27 = smov %s1250_s30  ;;  %23 = sbr.rel (!%p21_p5) target bundleno = 5 (0x5), region = 111 }
 0x53f   :  { %825 = vsyncpa [#allocation3], 1 }
 0x540   :  { %827 = vsyncpa [#allocation3 + $0x1], 1 }
 0x541   :  { %828 = vsyncpa [#allocation5], 1 }
 0x542   :  { %830 = vsyncpa [#allocation5 + $0x1], 1 }

</bundles_post_ra>
